<compile_context>
chip_gen: v7x
topology: tpu7x:2x2x1
jax: 0.10.0
libtpu: 0.0.40
codegen_flags: <defaults>
</compile_context>

<pallas_src>
import jax
import jax.numpy as jnp
from jax.experimental import pallas as pl
from jax.experimental.pallas import tpu as pltpu

LANE = 128          # pad channel dims to the 128-lane vreg width (lane-dense)
ROW_ALIGN = 16      # row padding unit (covers f32 (8,128) and bf16 (16,128) tiles)
LEAKY_SLOPE = 0.2
BN_EPS = 1e-5
NORM_EPS = 1e-8     # TODO(synk): exact deltaconv VectorNonLin clamp constant not reproduced.

_FALLBACK_VMEM_BYTES = 64 * 1024 * 1024   # v7x per-core physical; conservative default


def _round_up(x, m):
    return (x + m - 1) // m * m


def _leaky_relu(x):
    return jnp.where(x >= 0, x, LEAKY_SLOPE * x)


# ----------------------------------------------------------------------------
# Generation-aware VMEM budgets (v5e/v6e: 128 MiB, v7x: 64 MiB per core)
# ----------------------------------------------------------------------------
def _query_vmem_bytes():
    try:
        info = pltpu.get_tpu_info()
        v = int(getattr(info, "vmem_capacity_bytes", 0) or 0)
        if v > 0:
            return v
    except Exception:
        pass
    return _FALLBACK_VMEM_BYTES


def _vmem_budgets():
    vmem = _query_vmem_bytes()
    budget = int(vmem * 0.72)   # ~92 MiB on v5e/v6e, ~46 MiB on v7x
    limit = int(vmem * 0.90)    # explicit scoped-VMEM limit handed to Mosaic
    return budget, limit, vmem


def _fused_vmem_estimate(npad, cpad, mm_bytes):
    rows = 3 * npad                              # scalar rows + 2 vector-component rows
    est = 2 * rows * cpad * mm_bytes             # resident activation outputs (buffered)
    est += 2 * rows * cpad * mm_bytes            # aliased input windows (double-buffered)
    est += 12 * npad * cpad * 4                  # in-kernel f32 temporaries (vector-stream peak)
    est += 2 * 2 * cpad * cpad * mm_bytes        # double-buffered W_s / W_v blocks
    est += 32 * cpad * 4                         # gammas / betas
    return est


def _tile_vmem_estimate(tile_n, cpad, mm_bytes):
    est = 2 * 3 * tile_n * cpad * mm_bytes       # double-buffered input tiles
    est += 2 * 3 * tile_n * cpad * 4             # double-buffered output tiles (f32 worst case)
    est += 12 * tile_n * cpad * 4                # f32 temporaries
    est += 2 * 2 * cpad * cpad * mm_bytes        # weights
    est += 64 * cpad * 4                         # params + stats scratch
    return est


# ----------------------------------------------------------------------------
# Parameter / input packing (channels zero-padded to the 128-lane width)
# ----------------------------------------------------------------------------
def _pack_params(params, cpad, mm_dtype):
    def pad_w(a):
        return jnp.pad(a, ((0, cpad - a.shape[0]), (0, cpad - a.shape[1])))

    def pad_p(a):
        return jnp.pad(a, ((0, 0), (0, cpad - a.shape[1])))

    ws = jnp.stack([pad_w(p["w_s"]) for p in params]).astype(mm_dtype)
    wv = jnp.stack([pad_w(p["w_v"]) for p in params]).astype(mm_dtype)
    gs = jnp.stack([pad_p(p["g_s"]) for p in params]).astype(jnp.float32)
    bs = jnp.stack([pad_p(p["b_s"]) for p in params]).astype(jnp.float32)
    gv = jnp.stack([pad_p(p["g_v"]) for p in params]).astype(jnp.float32)
    bv = jnp.stack([pad_p(p["b_v"]) for p in params]).astype(jnp.float32)
    return ws, gs, bs, wv, gv, bv


# ----------------------------------------------------------------------------
# Fully fused kernel: grid=(num_layers,), activations VMEM-resident in matmul_dtype
# ----------------------------------------------------------------------------
def _make_fused_kernel(*, n_true, npad, cpad, matmul_dtype):
    inv_n = 1.0 / float(n_true)
    need_row_mask = (npad != n_true)

    def kernel(x_in_ref, v_in_ref, ws_ref, gs_ref, bs_ref, wv_ref, gv_ref, bv_ref,
               xo_ref, vo_ref):
        layer = pl.program_id(0)

        # Layer 0: seed the VMEM-resident activations.  Output refs (constant
        # index_map, aliased onto the inputs at HBM level) double as the
        # inter-layer activation buffers; written back to HBM once at the end.
        @pl.when(layer == 0)
        def _():
            xo_ref[...] = x_in_ref[...].astype(xo_ref.dtype)
            vo_ref[...] = v_in_ref[...].astype(vo_ref.dtype)

        if need_row_mask:
            keep = jax.lax.broadcasted_iota(jnp.int32, (npad, 1), 0) < n_true
        else:
            keep = None

        # ---- scalar stream: Linear -> BN(batch stats, one-pass) -> LeakyReLU ----
        x = xo_ref[...]                                # [NPAD, CPAD], matmul_dtype
        if x.dtype != matmul_dtype:
            x = x.astype(matmul_dtype)
        y = jnp.dot(x, ws_ref[...], preferred_element_type=jnp.float32)
        s1 = jnp.sum(y, axis=0, keepdims=True)
        s2 = jnp.sum(y * y, axis=0, keepdims=True)
        mean = s1 * inv_n
        var = jnp.maximum(s2 * inv_n - mean * mean, 0.0)   # clamp f32 cancellation
        x_new = _leaky_relu((y - mean) * jax.lax.rsqrt(var + BN_EPS)
                            * gs_ref[...] + bs_ref[...])
        if keep is not None:
            # Padded rows must stay exactly zero so they never pollute the next
            # layer's batch statistics (zero rows contribute zero to sum/sumsq).
            x_new = jnp.where(keep, x_new, 0.0)
        # Store the scalar stream now (before the vector stream) to shrink the
        # peak set of live [NPAD, CPAD] f32 temporaries.
        xo_ref[...] = x_new.astype(xo_ref.dtype)

        # ---- vector stream: one merged [2N, C] x [C, C] matmul ----
        v = vo_ref[...].reshape(2 * npad, cpad)
        if v.dtype != matmul_dtype:
            v = v.astype(matmul_dtype)
        yv = jnp.dot(v, wv_ref[...], preferred_element_type=jnp.float32)
        y0 = yv[:npad]
        y1 = yv[npad:]
        sq = y0 * y0 + y1 * y1
        inv_nrm = jax.lax.rsqrt(jnp.maximum(sq, NORM_EPS * NORM_EPS))
        nrm = sq * inv_nrm                      # == sqrt(sq) whenever sq >= eps^2
        ns1 = jnp.sum(nrm, axis=0, keepdims=True)
        ns2 = jnp.sum(sq, axis=0, keepdims=True)    # E[nrm^2] == E[sq]
        nmean = ns1 * inv_n
        nvar = jnp.maximum(ns2 * inv_n - nmean * nmean, 0.0)
        nrm_bn = ((nrm - nmean) * jax.lax.rsqrt(nvar + BN_EPS)
                  * gv_ref[...] + bv_ref[...])
        scale = _leaky_relu(nrm_bn) * inv_nrm
        v0_new = y0 * scale
        v1_new = y1 * scale
        if keep is not None:
            v0_new = jnp.where(keep, v0_new, 0.0)
            v1_new = jnp.where(keep, v1_new, 0.0)

        vo_ref[0] = v0_new.astype(vo_ref.dtype)
        vo_ref[1] = v1_new.astype(vo_ref.dtype)

        # TODO(synk): optional in-kernel row chunking (fori_loop over ~1024-row
        # chunks) would bound the f32 temporaries to O(chunk) and let larger N
        # stay fused on v7x's 64 MiB VMEM.

    return kernel


def _fused_call(x_pad, v_pad, ws, gs, bs, wv, gv, bv, *, n_true, matmul_dtype,
                vmem_limit_bytes):
    num_layers, cpad, _ = ws.shape
    npad = x_pad.shape[0]
    kernel = _make_fused_kernel(n_true=n_true, npad=npad, cpad=cpad,
                                matmul_dtype=matmul_dtype)
    wspec = pl.BlockSpec((None, cpad, cpad), lambda l: (l, 0, 0))
    pspec = pl.BlockSpec((None, 1, cpad), lambda l: (l, 0, 0))
    return pl.pallas_call(
        kernel,
        out_shape=(jax.ShapeDtypeStruct((npad, cpad), matmul_dtype),
                   jax.ShapeDtypeStruct((2, npad, cpad), matmul_dtype)),
        grid=(num_layers,),
        in_specs=[
            pl.BlockSpec((npad, cpad), lambda l: (0, 0)),
            pl.BlockSpec((2, npad, cpad), lambda l: (0, 0, 0)),
            wspec, pspec, pspec, wspec, pspec, pspec,
        ],
        out_specs=(pl.BlockSpec((npad, cpad), lambda l: (0, 0)),
                   pl.BlockSpec((2, npad, cpad), lambda l: (0, 0, 0))),
        input_output_aliases={0: 0, 1: 1},
        compiler_params=pltpu.CompilerParams(
            # Layer axis is a true dependence chain; must stay sequential.
            # TODO(synk): on v7x, split scalar/vector streams across the 2 TCs.
            dimension_semantics=("arbitrary",),
            vmem_limit_bytes=vmem_limit_bytes),
    )(x_pad, v_pad, ws, gs, bs, wv, gv, bv)


# ----------------------------------------------------------------------------
# Large-N path: per-layer fused (scalar+vector) kernel, two-pass grid over row
# tiles so BatchNorm statistics stay global.
# ----------------------------------------------------------------------------
def _make_tiled_layer_kernel(*, n_true, tile_n, cpad, matmul_dtype, need_row_mask):
    inv_n = 1.0 / float(n_true)

    def kernel(x_ref, v_ref, ws_ref, gs_ref, bs_ref, wv_ref, gv_ref, bv_ref,
               xo_ref, vo_ref, s1s, s2s, s1v, s2v):
        p = pl.program_id(0)   # 0: accumulate global stats, 1: normalize + write
        t = pl.program_id(1)   # row-tile index

        @pl.when((p == 0) & (t == 0))
        def _():
            s1s[...] = jnp.zeros_like(s1s)
            s2s[...] = jnp.zeros_like(s2s)
            s1v[...] = jnp.zeros_like(s1v)
            s2v[...] = jnp.zeros_like(s2v)

        x = x_ref[...]                                    # [T, C]
        v = v_ref[...].reshape(2 * tile_n, cpad)          # [2T, C]
        if x.dtype != matmul_dtype:
            x = x.astype(matmul_dtype)
        if v.dtype != matmul_dtype:
            v = v.astype(matmul_dtype)

        y = jnp.dot(x, ws_ref[...], preferred_element_type=jnp.float32)
        yv = jnp.dot(v, wv_ref[...], preferred_element_type=jnp.float32)
        y0 = yv[:tile_n]
        y1 = yv[tile_n:]
        sq = y0 * y0 + y1 * y1
        inv_nrm = jax.lax.rsqrt(jnp.maximum(sq, NORM_EPS * NORM_EPS))
        nrm = sq * inv_nrm

        @pl.when(p == 0)
        def _():
            # Zero-padded rows contribute exactly zero to all sums, so dividing
            # by the true point count n_true gives the correct global stats.
            s1s[...] += jnp.sum(y, axis=0, keepdims=True)
            s2s[...] += jnp.sum(y * y, axis=0, keepdims=True)
            s1v[...] += jnp.sum(nrm, axis=0, keepdims=True)
            s2v[...] += jnp.sum(sq, axis=0, keepdims=True)

        @pl.when(p == 1)
        def _():
            mean = s1s[...] * inv_n
            var = jnp.maximum(s2s[...] * inv_n - mean * mean, 0.0)
            x_new = _leaky_relu((y - mean) * jax.lax.rsqrt(var + BN_EPS)
                                * gs_ref[...] + bs_ref[...])

            nmean = s1v[...] * inv_n
            nvar = jnp.maximum(s2v[...] * inv_n - nmean * nmean, 0.0)
            nrm_bn = ((nrm - nmean) * jax.lax.rsqrt(nvar + BN_EPS)
                      * gv_ref[...] + bv_ref[...])
            scale = _leaky_relu(nrm_bn) * inv_nrm
            v0_new = y0 * scale
            v1_new = y1 * scale

            def _store(xa, v0a, v1a):
                xo_ref[...] = xa.astype(xo_ref.dtype)
                vo_ref[0] = v0a.astype(vo_ref.dtype)
                vo_ref[1] = v1a.astype(vo_ref.dtype)

            if need_row_mask:
                # Padding rows only exist in the last row tile; gate the masking
                # selects there and store other tiles unmasked (VPU saving).
                is_last = t == pl.num_programs(1) - 1

                @pl.when(is_last)
                def _():
                    rows = (t * tile_n +
                            jax.lax.broadcasted_iota(jnp.int32, (tile_n, 1), 0))
                    keep = rows < n_true
                    _store(jnp.where(keep, x_new, 0.0),
                           jnp.where(keep, v0_new, 0.0),
                           jnp.where(keep, v1_new, 0.0))

                @pl.when(jnp.logical_not(is_last))
                def _():
                    _store(x_new, v0_new, v1_new)
            else:
                _store(x_new, v0_new, v1_new)

    return kernel


def _layer_tiled_call(x_a, v_a, ws_l, gs_l, bs_l, wv_l, gv_l, bv_l, *,
                      n_true, tile_n, matmul_dtype, out_dtype, vmem_limit_bytes):
    npad, cpad = x_a.shape
    nt = npad // tile_n
    kernel = _make_tiled_layer_kernel(n_true=n_true, tile_n=tile_n, cpad=cpad,
                                      matmul_dtype=matmul_dtype,
                                      need_row_mask=(npad != n_true))
    wspec = pl.BlockSpec((cpad, cpad), lambda p, t: (0, 0))
    pspec = pl.BlockSpec((1, cpad), lambda p, t: (0, 0))
    # Outputs are only produced in pass 1; during pass 0 keep the output window
    # parked on block 0 (p * t == 0) so no garbage write-backs are issued.
    return pl.pallas_call(
        kernel,
        out_shape=(jax.ShapeDtypeStruct((npad, cpad), out_dtype),
                   jax.ShapeDtypeStruct((2, npad, cpad), out_dtype)),
        grid=(2, nt),    # pass axis (stats / normalize), then row tiles
        in_specs=[
            pl.BlockSpec((tile_n, cpad), lambda p, t: (t, 0)),
            pl.BlockSpec((2, tile_n, cpad), lambda p, t: (0, t, 0)),
            wspec, pspec, pspec, wspec, pspec, pspec,
        ],
        out_specs=(pl.BlockSpec((tile_n, cpad), lambda p, t: (p * t, 0)),
                   pl.BlockSpec((2, tile_n, cpad), lambda p, t: (0, p * t, 0))),
        scratch_shapes=[pltpu.VMEM((1, cpad), jnp.float32) for _ in range(4)],
        compiler_params=pltpu.CompilerParams(
            # Both axes stay sequential: pass 0 accumulates global BN stats into
            # VMEM scratch that pass 1 consumes.
            # TODO(synk): on v7x, split the row-tile axis across the 2 TensorCores
            # and combine partial sums through CMEM/VMEM_SHARED + core_barrier.
            dimension_semantics=("arbitrary", "arbitrary"),
            vmem_limit_bytes=vmem_limit_bytes),
    )(x_a, v_a, ws_l, gs_l, bs_l, wv_l, gv_l, bv_l)


# ----------------------------------------------------------------------------
# ScalarVectorMLP forward
# ----------------------------------------------------------------------------
def scalar_vector_mlp(x, v, params, *, matmul_dtype=jnp.bfloat16,
                      force_tiled=False, tile_n=None):
    """x: [N, C0] scalar features, v: [2N, C0] interleaved vector features."""
    n, c0 = x.shape
    assert v.shape == (2 * n, c0)
    channels = [c0] + [p["w_s"].shape[1] for p in params]
    c_last = channels[-1]
    cpad = _round_up(max(channels), LANE)
    num_layers = len(params)
    mm_bytes = jnp.dtype(matmul_dtype).itemsize

    fused_budget, vmem_limit, vmem_bytes = _vmem_budgets()

    npad_min = _round_up(n, ROW_ALIGN)
    use_tiled = force_tiled or (
        _fused_vmem_estimate(npad_min, cpad, mm_bytes) > fused_budget)

    if use_tiled:
        if tile_n is None:
            tile_n = 4096 if vmem_bytes >= (96 << 20) else 2048
            while (tile_n > 2 * ROW_ALIGN and
                   _tile_vmem_estimate(tile_n, cpad, mm_bytes) > fused_budget):
                tile_n //= 2
        tile_n = max(ROW_ALIGN, _round_up(min(tile_n, npad_min), ROW_ALIGN))
        npad = _round_up(n, tile_n)
    else:
        npad = npad_min

    # Pack / pad inputs: scalar [NPAD, CPAD], vector component-major [2, NPAD, CPAD].
    x_pad = jnp.pad(x, ((0, npad - n), (0, cpad - c0)))
    v_cm = jnp.transpose(v.reshape(n, 2, c0), (1, 0, 2))
    v_pad = jnp.pad(v_cm, ((0, 0), (0, npad - n), (0, cpad - c0)))

    ws, gs, bs, wv, gv, bv = _pack_params(params, cpad, matmul_dtype)

    if use_tiled:
        x_a = x_pad.astype(matmul_dtype)
        v_a = v_pad.astype(matmul_dtype)
        for l in range(num_layers):
            out_dtype = jnp.float32 if l == num_layers - 1 else matmul_dtype
            x_a, v_a = _layer_tiled_call(
                x_a, v_a, ws[l], gs[l], bs[l], wv[l], gv[l], bv[l],
                n_true=n, tile_n=tile_n, matmul_dtype=matmul_dtype,
                out_dtype=out_dtype, vmem_limit_bytes=vmem_limit)
        xo, vo = x_a, v_a
    else:
        xo, vo = _fused_call(
            x_pad.astype(matmul_dtype), v_pad.astype(matmul_dtype),
            ws, gs, bs, wv, gv, bv, n_true=n, matmul_dtype=matmul_dtype,
            vmem_limit_bytes=vmem_limit)

    x_out = xo[:n, :c_last].astype(jnp.float32)
    v_out = (jnp.transpose(vo[:, :n, :c_last], (1, 0, 2))
             .reshape(2 * n, c_last).astype(jnp.float32))
    return x_out, v_out


# ----------------------------------------------------------------------------
# Pure-JAX reference (PyTorch math) used only to sanity-check the kernels.
# ----------------------------------------------------------------------------
def _reference(x, v, params, matmul_dtype=jnp.float32):
    n, c0 = x.shape
    v_cm = jnp.transpose(v.reshape(n, 2, c0), (1, 0, 2))
    for p in params:
        y = jnp.dot(x.astype(matmul_dtype), p["w_s"].astype(matmul_dtype),
                    preferred_element_type=jnp.float32)
        m = y.mean(0, keepdims=True)
        va = ((y - m) ** 2).mean(0, keepdims=True)
        y = (y - m) / jnp.sqrt(va + BN_EPS) * p["g_s"] + p["b_s"]
        x = jnp.where(y >= 0, y, LEAKY_SLOPE * y)

        y0 = jnp.dot(v_cm[0].astype(matmul_dtype), p["w_v"].astype(matmul_dtype),
                     preferred_element_type=jnp.float32)
        y1 = jnp.dot(v_cm[1].astype(matmul_dtype), p["w_v"].astype(matmul_dtype),
                     preferred_element_type=jnp.float32)
        nrm = jnp.sqrt(y0 ** 2 + y1 ** 2)
        m = nrm.mean(0, keepdims=True)
        va = ((nrm - m) ** 2).mean(0, keepdims=True)
        nb = (nrm - m) / jnp.sqrt(va + BN_EPS) * p["g_v"] + p["b_v"]
        sc = jnp.where(nb >= 0, nb, LEAKY_SLOPE * nb) / jnp.maximum(nrm, NORM_EPS)
        v_cm = jnp.stack([y0 * sc, y1 * sc], axis=0)
    return x, jnp.transpose(v_cm, (1, 0, 2)).reshape(2 * n, v_cm.shape[-1])


def init_params(key, channels):
    params = []
    for i in range(1, len(channels)):
        c_in, c_out = channels[i - 1], channels[i]
        key, k1, k2, k3, k4, k5, k6 = jax.random.split(key, 7)
        params.append({
            # Linear weights stored pre-transposed: [Cin, Cout]
            "w_s": jax.random.normal(k1, (c_in, c_out), jnp.float32) * 0.2,
            "g_s": 1.0 + 0.1 * jax.random.normal(k2, (1, c_out), jnp.float32),
            "b_s": 0.1 * jax.random.normal(k3, (1, c_out), jnp.float32),
            "w_v": jax.random.normal(k4, (c_in, c_out), jnp.float32) * 0.2,
            "g_v": 1.0 + 0.1 * jax.random.normal(k5, (1, c_out), jnp.float32),
            "b_v": 0.1 * jax.random.normal(k6, (1, c_out), jnp.float32),
        })
    return params


if __name__ == "__main__":
    key = jax.random.PRNGKey(0)
    channels = (8, 32, 16)   # ScalarVectorMLP(channels=[8, 32, 16])

    k_x, k_v, k_p, k_x2, k_v2 = jax.random.split(key, 5)
    params = init_params(k_p, channels)

    # --- Case 1: small N, fully fused single-kernel path, f32 matmuls ---
    n1 = 16
    x1 = jax.random.normal(k_x, (n1, channels[0]), jnp.float32)
    v1 = jax.random.normal(k_v, (2 * n1, channels[0]), jnp.float32)

    xo, vo = scalar_vector_mlp(x1, v1, params, matmul_dtype=jnp.float32)
    jax.block_until_ready((xo, vo))
    xr, vr = _reference(x1, v1, params, jnp.float32)
    assert xo.shape == (n1, channels[-1]) and vo.shape == (2 * n1, channels[-1])
    assert jnp.allclose(xo, xr, atol=2e-3, rtol=2e-3)
    assert jnp.allclose(vo, vr, atol=2e-3, rtol=2e-3)

    # --- Case 2: fused path, bf16 matmuls + bf16-resident activations ---
    xo, vo = scalar_vector_mlp(x1, v1, params, matmul_dtype=jnp.bfloat16)
    jax.block_until_ready((xo, vo))
    xr, vr = _reference(x1, v1, params, jnp.bfloat16)   # like-for-like bf16 reference
    assert jnp.allclose(xo, xr, atol=1e-2, rtol=1e-2)
    assert jnp.allclose(vo, vr, atol=1e-2, rtol=1e-2)

    # --- Case 3: two-pass N-tiled path (global BN stats, last-tile row masking) ---
    n2 = 200
    x2 = jax.random.normal(k_x2, (n2, channels[0]), jnp.float32)
    v2 = jax.random.normal(k_v2, (2 * n2, channels[0]), jnp.float32)
    xo, vo = scalar_vector_mlp(x2, v2, params, matmul_dtype=jnp.bfloat16,
                               force_tiled=True, tile_n=64)
    jax.block_until_ready((xo, vo))
    xr, vr = _reference(x2, v2, params, jnp.bfloat16)
    assert xo.shape == (n2, channels[-1]) and vo.shape == (2 * n2, channels[-1])
    assert jnp.allclose(xo, xr, atol=1e-2, rtol=1e-2)
    assert jnp.allclose(vo, vr, atol=1e-2, rtol=1e-2)

    print("KERNEL_OK")
</pallas_src>

<mosaic_0001>
module attributes {stable_mosaic.version = 11 : i64} {
  func.func @kernel(%arg0: i32, %arg1: memref<16x128xf32, #tpu.memory_space<vmem>>, %arg2: memref<2x16x128xf32, #tpu.memory_space<vmem>>, %arg3: memref<1x128x128xf32, #tpu.memory_space<vmem>>, %arg4: memref<1x1x128xf32, #tpu.memory_space<vmem>>, %arg5: memref<1x1x128xf32, #tpu.memory_space<vmem>>, %arg6: memref<1x128x128xf32, #tpu.memory_space<vmem>>, %arg7: memref<1x1x128xf32, #tpu.memory_space<vmem>>, %arg8: memref<1x1x128xf32, #tpu.memory_space<vmem>>, %arg9: memref<16x128xf32, #tpu.memory_space<vmem>>, %arg10: memref<2x16x128xf32, #tpu.memory_space<vmem>>) attributes {dimension_semantics = [#tpu.dimension_semantics<arbitrary>], iteration_bounds = array<i64: 2>, scalar_prefetch = 0 : i64, scratch_operands = 0 : i64, tpu.core_type = #tpu.core_type<tc>, window_params = [{pipeline_mode = #tpu.pipeline_mode<synchronous>, transform_indices = @transform_0, window_bounds = array<i64: 16, 128>}, {pipeline_mode = #tpu.pipeline_mode<synchronous>, transform_indices = @transform_1, window_bounds = array<i64: 2, 16, 128>}, {transform_indices = @transform_2, window_bounds = array<i64: 1, 128, 128>}, {transform_indices = @transform_3, window_bounds = array<i64: 1, 1, 128>}, {transform_indices = @transform_4, window_bounds = array<i64: 1, 1, 128>}, {transform_indices = @transform_5, window_bounds = array<i64: 1, 128, 128>}, {transform_indices = @transform_6, window_bounds = array<i64: 1, 1, 128>}, {transform_indices = @transform_7, window_bounds = array<i64: 1, 1, 128>}, {pipeline_mode = #tpu.pipeline_mode<synchronous>, transform_indices = @transform_8, window_bounds = array<i64: 16, 128>}, {pipeline_mode = #tpu.pipeline_mode<synchronous>, transform_indices = @transform_9, window_bounds = array<i64: 2, 16, 128>}]} {
    %c0_i32 = arith.constant 0 : i32
    %0 = arith.cmpi eq, %arg0, %c0_i32 : i32
    %1 = arith.extui %0 : i1 to i32
    %c0_i32_0 = arith.constant 0 : i32
    %2 = arith.cmpi ne, %1, %c0_i32_0 : i32
    scf.if %2 {
      %c0_48 = arith.constant 0 : index
      %c0_49 = arith.constant 0 : index
      %96 = vector.load %arg1[%c0_48, %c0_49] : memref<16x128xf32, #tpu.memory_space<vmem>>, vector<16x128xf32>
      %c0_50 = arith.constant 0 : index
      %c0_51 = arith.constant 0 : index
      %97 = vector.load %arg9[%c0_50, %c0_51] : memref<16x128xf32, #tpu.memory_space<vmem>>, vector<16x128xf32>
      tpu.vector_store %arg9[%c0_50, %c0_51], %96 {strides = array<i32>} : memref<16x128xf32, #tpu.memory_space<vmem>>, vector<16x128xf32>,
      %c0_52 = arith.constant 0 : index
      %c0_53 = arith.constant 0 : index
      %c0_54 = arith.constant 0 : index
      %98 = vector.load %arg2[%c0_52, %c0_53, %c0_54] : memref<2x16x128xf32, #tpu.memory_space<vmem>>, vector<2x16x128xf32>
      %c0_55 = arith.constant 0 : index
      %c0_56 = arith.constant 0 : index
      %c0_57 = arith.constant 0 : index
      %99 = vector.load %arg10[%c0_55, %c0_56, %c0_57] : memref<2x16x128xf32, #tpu.memory_space<vmem>>, vector<2x16x128xf32>
      tpu.vector_store %arg10[%c0_55, %c0_56, %c0_57], %98 {strides = array<i32>} : memref<2x16x128xf32, #tpu.memory_space<vmem>>, vector<2x16x128xf32>,
    } else {
    }
    %c0 = arith.constant 0 : index
    %c0_1 = arith.constant 0 : index
    %3 = vector.load %arg9[%c0, %c0_1] : memref<16x128xf32, #tpu.memory_space<vmem>>, vector<16x128xf32>
    %c0_2 = arith.constant 0 : index
    %c0_3 = arith.constant 0 : index
    %c0_4 = arith.constant 0 : index
    %4 = vector.load %arg3[%c0_2, %c0_3, %c0_4] : memref<1x128x128xf32, #tpu.memory_space<vmem>>, vector<1x128x128xf32>
    %5 = vector.shape_cast %4 : vector<1x128x128xf32> to vector<128x128xf32>
    %cst = arith.constant dense<0.000000e+00> : vector<16x128xf32>
    %6 = tpu.matmul %3, %5, %cst {dimension_numbers = #tpu.dot_dimension_numbers<[1], [0], [0], [1], [0, 0, 1, 1], [], []>} : vector<16x128xf32>, vector<128x128xf32>, vector<16x128xf32> -> vector<16x128xf32>
    %cst_5 = arith.constant dense<0.000000e+00> : vector<128xf32>
    %7 = vector.multi_reduction <add>, %6, %cst_5 [0] : vector<16x128xf32> to vector<128xf32>
    %8 = vector.shape_cast %7 : vector<128xf32> to vector<1x128xf32>
    %9 = arith.mulf %6, %6 : vector<16x128xf32>
    %cst_6 = arith.constant dense<0.000000e+00> : vector<128xf32>
    %10 = vector.multi_reduction <add>, %9, %cst_6 [0] : vector<16x128xf32> to vector<128xf32>
    %11 = vector.shape_cast %10 : vector<128xf32> to vector<1x128xf32>
    %cst_7 = arith.constant 6.250000e-02 : f32
    %12 = vector.broadcast %cst_7 : f32 to vector<1x128xf32>
    %13 = arith.mulf %8, %12 : vector<1x128xf32>
    %cst_8 = arith.constant 6.250000e-02 : f32
    %14 = vector.broadcast %cst_8 : f32 to vector<1x128xf32>
    %15 = arith.mulf %11, %14 : vector<1x128xf32>
    %16 = arith.mulf %13, %13 : vector<1x128xf32>
    %17 = arith.subf %15, %16 : vector<1x128xf32>
    %cst_9 = arith.constant 0.000000e+00 : f32
    %18 = vector.broadcast %cst_9 : f32 to vector<1x128xf32>
    %19 = arith.maximumf %17, %18 : vector<1x128xf32>
    %20 = vector.broadcast %13 : vector<1x128xf32> to vector<16x128xf32>
    %21 = arith.subf %6, %20 : vector<16x128xf32>
    %cst_10 = arith.constant 9.99999974E-6 : f32
    %22 = vector.broadcast %cst_10 : f32 to vector<1x128xf32>
    %23 = arith.addf %19, %22 : vector<1x128xf32>
    %24 = math.rsqrt %23 : vector<1x128xf32>
    %25 = vector.broadcast %24 : vector<1x128xf32> to vector<16x128xf32>
    %26 = arith.mulf %21, %25 : vector<16x128xf32>
    %c0_11 = arith.constant 0 : index
    %c0_12 = arith.constant 0 : index
    %c0_13 = arith.constant 0 : index
    %27 = vector.load %arg4[%c0_11, %c0_12, %c0_13] : memref<1x1x128xf32, #tpu.memory_space<vmem>>, vector<1x1x128xf32>
    %28 = vector.shape_cast %27 : vector<1x1x128xf32> to vector<1x128xf32>
    %29 = vector.broadcast %28 : vector<1x128xf32> to vector<16x128xf32>
    %30 = arith.mulf %26, %29 : vector<16x128xf32>
    %c0_14 = arith.constant 0 : index
    %c0_15 = arith.constant 0 : index
    %c0_16 = arith.constant 0 : index
    %31 = vector.load %arg5[%c0_14, %c0_15, %c0_16] : memref<1x1x128xf32, #tpu.memory_space<vmem>>, vector<1x1x128xf32>
    %32 = vector.shape_cast %31 : vector<1x1x128xf32> to vector<1x128xf32>
    %33 = vector.broadcast %32 : vector<1x128xf32> to vector<16x128xf32>
    %34 = arith.addf %30, %33 : vector<16x128xf32>
    %cst_17 = arith.constant 0.000000e+00 : f32
    %35 = vector.broadcast %cst_17 : f32 to vector<16x128xf32>
    %36 = arith.cmpf oge, %34, %35 : vector<16x128xf32>
    %cst_18 = arith.constant 2.000000e-01 : f32
    %37 = vector.broadcast %cst_18 : f32 to vector<16x128xf32>
    %38 = arith.mulf %37, %34 : vector<16x128xf32>
    %39 = arith.select %36, %34, %38 : vector<16x128xi1>, vector<16x128xf32>
    %c0_19 = arith.constant 0 : index
    %c0_20 = arith.constant 0 : index
    %40 = vector.load %arg9[%c0_19, %c0_20] : memref<16x128xf32, #tpu.memory_space<vmem>>, vector<16x128xf32>
    tpu.vector_store %arg9[%c0_19, %c0_20], %39 {strides = array<i32>} : memref<16x128xf32, #tpu.memory_space<vmem>>, vector<16x128xf32>,
    %c0_21 = arith.constant 0 : index
    %c0_22 = arith.constant 0 : index
    %c0_23 = arith.constant 0 : index
    %41 = vector.load %arg10[%c0_21, %c0_22, %c0_23] : memref<2x16x128xf32, #tpu.memory_space<vmem>>, vector<2x16x128xf32>
    %42 = vector.shape_cast %41 : vector<2x16x128xf32> to vector<32x128xf32>
    %c0_24 = arith.constant 0 : index
    %c0_25 = arith.constant 0 : index
    %c0_26 = arith.constant 0 : index
    %43 = vector.load %arg6[%c0_24, %c0_25, %c0_26] : memref<1x128x128xf32, #tpu.memory_space<vmem>>, vector<1x128x128xf32>
    %44 = vector.shape_cast %43 : vector<1x128x128xf32> to vector<128x128xf32>
    %cst_27 = arith.constant dense<0.000000e+00> : vector<32x128xf32>
    %45 = tpu.matmul %42, %44, %cst_27 {dimension_numbers = #tpu.dot_dimension_numbers<[1], [0], [0], [1], [0, 0, 1, 1], [], []>} : vector<32x128xf32>, vector<128x128xf32>, vector<32x128xf32> -> vector<32x128xf32>
    %46 = vector.extract_strided_slice %45 {offsets = [0, 0], sizes = [16, 128], strides = [1, 1]} : vector<32x128xf32> to vector<16x128xf32>
    %47 = vector.extract_strided_slice %45 {offsets = [16, 0], sizes = [16, 128], strides = [1, 1]} : vector<32x128xf32> to vector<16x128xf32>
    %48 = arith.mulf %46, %46 : vector<16x128xf32>
    %49 = arith.mulf %47, %47 : vector<16x128xf32>
    %50 = arith.addf %48, %49 : vector<16x128xf32>
    %cst_28 = arith.constant 1.000000e-16 : f32
    %51 = vector.broadcast %cst_28 : f32 to vector<16x128xf32>
    %52 = arith.maximumf %50, %51 : vector<16x128xf32>
    %53 = math.rsqrt %52 : vector<16x128xf32>
    %54 = arith.mulf %50, %53 : vector<16x128xf32>
    %cst_29 = arith.constant dense<0.000000e+00> : vector<128xf32>
    %55 = vector.multi_reduction <add>, %54, %cst_29 [0] : vector<16x128xf32> to vector<128xf32>
    %56 = vector.shape_cast %55 : vector<128xf32> to vector<1x128xf32>
    %cst_30 = arith.constant dense<0.000000e+00> : vector<128xf32>
    %57 = vector.multi_reduction <add>, %50, %cst_30 [0] : vector<16x128xf32> to vector<128xf32>
    %58 = vector.shape_cast %57 : vector<128xf32> to vector<1x128xf32>
    %cst_31 = arith.constant 6.250000e-02 : f32
    %59 = vector.broadcast %cst_31 : f32 to vector<1x128xf32>
    %60 = arith.mulf %56, %59 : vector<1x128xf32>
    %cst_32 = arith.constant 6.250000e-02 : f32
    %61 = vector.broadcast %cst_32 : f32 to vector<1x128xf32>
    %62 = arith.mulf %58, %61 : vector<1x128xf32>
    %63 = arith.mulf %60, %60 : vector<1x128xf32>
    %64 = arith.subf %62, %63 : vector<1x128xf32>
    %cst_33 = arith.constant 0.000000e+00 : f32
    %65 = vector.broadcast %cst_33 : f32 to vector<1x128xf32>
    %66 = arith.maximumf %64, %65 : vector<1x128xf32>
    %67 = vector.broadcast %60 : vector<1x128xf32> to vector<16x128xf32>
    %68 = arith.subf %54, %67 : vector<16x128xf32>
    %cst_34 = arith.constant 9.99999974E-6 : f32
    %69 = vector.broadcast %cst_34 : f32 to vector<1x128xf32>
    %70 = arith.addf %66, %69 : vector<1x128xf32>
    %71 = math.rsqrt %70 : vector<1x128xf32>
    %72 = vector.broadcast %71 : vector<1x128xf32> to vector<16x128xf32>
    %73 = arith.mulf %68, %72 : vector<16x128xf32>
    %c0_35 = arith.constant 0 : index
    %c0_36 = arith.constant 0 : index
    %c0_37 = arith.constant 0 : index
    %74 = vector.load %arg7[%c0_35, %c0_36, %c0_37] : memref<1x1x128xf32, #tpu.memory_space<vmem>>, vector<1x1x128xf32>
    %75 = vector.shape_cast %74 : vector<1x1x128xf32> to vector<1x128xf32>
    %76 = vector.broadcast %75 : vector<1x128xf32> to vector<16x128xf32>
    %77 = arith.mulf %73, %76 : vector<16x128xf32>
    %c0_38 = arith.constant 0 : index
    %c0_39 = arith.constant 0 : index
    %c0_40 = arith.constant 0 : index
    %78 = vector.load %arg8[%c0_38, %c0_39, %c0_40] : memref<1x1x128xf32, #tpu.memory_space<vmem>>, vector<1x1x128xf32>
    %79 = vector.shape_cast %78 : vector<1x1x128xf32> to vector<1x128xf32>
    %80 = vector.broadcast %79 : vector<1x128xf32> to vector<16x128xf32>
    %81 = arith.addf %77, %80 : vector<16x128xf32>
    %cst_41 = arith.constant 0.000000e+00 : f32
    %82 = vector.broadcast %cst_41 : f32 to vector<16x128xf32>
    %83 = arith.cmpf oge, %81, %82 : vector<16x128xf32>
    %cst_42 = arith.constant 2.000000e-01 : f32
    %84 = vector.broadcast %cst_42 : f32 to vector<16x128xf32>
    %85 = arith.mulf %84, %81 : vector<16x128xf32>
    %86 = arith.select %83, %81, %85 : vector<16x128xi1>, vector<16x128xf32>
    %87 = arith.mulf %86, %53 : vector<16x128xf32>
    %88 = arith.mulf %46, %87 : vector<16x128xf32>
    %89 = arith.mulf %47, %87 : vector<16x128xf32>
    %c0_43 = arith.constant 0 : index
    %c0_44 = arith.constant 0 : index
    %c0_45 = arith.constant 0 : index
    %90 = vector.load %arg10[%c0_43, %c0_44, %c0_45] : memref<2x16x128xf32, #tpu.memory_space<vmem>>, vector<1x16x128xf32>
    %91 = vector.shape_cast %90 : vector<1x16x128xf32> to vector<16x128xf32>
    %92 = vector.shape_cast %88 : vector<16x128xf32> to vector<1x16x128xf32>
    tpu.vector_store %arg10[%c0_43, %c0_44, %c0_45], %92 {strides = array<i32>} : memref<2x16x128xf32, #tpu.memory_space<vmem>>, vector<1x16x128xf32>,
    %c1 = arith.constant 1 : index
    %c0_46 = arith.constant 0 : index
    %c0_47 = arith.constant 0 : index
    %93 = vector.load %arg10[%c1, %c0_46, %c0_47] : memref<2x16x128xf32, #tpu.memory_space<vmem>>, vector<1x16x128xf32>
    %94 = vector.shape_cast %93 : vector<1x16x128xf32> to vector<16x128xf32>
    %95 = vector.shape_cast %89 : vector<16x128xf32> to vector<1x16x128xf32>
    tpu.vector_store %arg10[%c1, %c0_46, %c0_47], %95 {strides = array<i32>} : memref<2x16x128xf32, #tpu.memory_space<vmem>>, vector<1x16x128xf32>,
    return
  }
  func.func @transform_0(%arg0: i32) -> (i32, i32) {
    %c0_i32 = arith.constant 0 : i32
    %c0_i32_0 = arith.constant 0 : i32
    %c0_i32_1 = arith.constant 0 : i32
    return %c0_i32, %c0_i32_0 : i32, i32
  }
  func.func @transform_1(%arg0: i32) -> (i32, i32, i32) {
    %c0_i32 = arith.constant 0 : i32
    %c0_i32_0 = arith.constant 0 : i32
    %c0_i32_1 = arith.constant 0 : i32
    %c0_i32_2 = arith.constant 0 : i32
    return %c0_i32, %c0_i32_0, %c0_i32_1 : i32, i32, i32
  }
  func.func @transform_2(%arg0: i32) -> (i32, i32, i32) {
    %c0_i32 = arith.constant 0 : i32
    %c0_i32_0 = arith.constant 0 : i32
    %c0_i32_1 = arith.constant 0 : i32
    return %arg0, %c0_i32, %c0_i32_0 : i32, i32, i32
  }
  func.func @transform_3(%arg0: i32) -> (i32, i32, i32) {
    %c0_i32 = arith.constant 0 : i32
    %c0_i32_0 = arith.constant 0 : i32
    %c0_i32_1 = arith.constant 0 : i32
    return %arg0, %c0_i32, %c0_i32_0 : i32, i32, i32
  }
  func.func @transform_4(%arg0: i32) -> (i32, i32, i32) {
    %c0_i32 = arith.constant 0 : i32
    %c0_i32_0 = arith.constant 0 : i32
    %c0_i32_1 = arith.constant 0 : i32
    return %arg0, %c0_i32, %c0_i32_0 : i32, i32, i32
  }
  func.func @transform_5(%arg0: i32) -> (i32, i32, i32) {
    %c0_i32 = arith.constant 0 : i32
    %c0_i32_0 = arith.constant 0 : i32
    %c0_i32_1 = arith.constant 0 : i32
    return %arg0, %c0_i32, %c0_i32_0 : i32, i32, i32
  }
  func.func @transform_6(%arg0: i32) -> (i32, i32, i32) {
    %c0_i32 = arith.constant 0 : i32
    %c0_i32_0 = arith.constant 0 : i32
    %c0_i32_1 = arith.constant 0 : i32
    return %arg0, %c0_i32, %c0_i32_0 : i32, i32, i32
  }
  func.func @transform_7(%arg0: i32) -> (i32, i32, i32) {
    %c0_i32 = arith.constant 0 : i32
    %c0_i32_0 = arith.constant 0 : i32
    %c0_i32_1 = arith.constant 0 : i32
    return %arg0, %c0_i32, %c0_i32_0 : i32, i32, i32
  }
  func.func @transform_8(%arg0: i32) -> (i32, i32) {
    %c0_i32 = arith.constant 0 : i32
    %c0_i32_0 = arith.constant 0 : i32
    %c0_i32_1 = arith.constant 0 : i32
    return %c0_i32, %c0_i32_0 : i32, i32
  }
  func.func @transform_9(%arg0: i32) -> (i32, i32, i32) {
    %c0_i32 = arith.constant 0 : i32
    %c0_i32_0 = arith.constant 0 : i32
    %c0_i32_1 = arith.constant 0 : i32
    %c0_i32_2 = arith.constant 0 : i32
    return %c0_i32, %c0_i32_0, %c0_i32_1 : i32, i32, i32
  }
}

</mosaic_0001>

<bundles_post_ra>
// kernel: tpu_custom_call.1
= control target key start
LH: loop header
LB: loop body
LE: loop exit
PB: predicated region body
PF: predicated region fallthrough
CT: control target
= control target key end

     0   :  { %s1927_s0 = inlined_call_operand.hbm [shape: f32[16,128], index: 0, kind: input, shape index: {}, may-alias: {0,8}]   ;;  %s1928_s1 = inlined_call_operand.hbm [shape: f32[2,16,128], index: 1, kind: input, shape index: {}, may-alias: {1,9}]   ;;  %s1929_s2 = inlined_call_operand.hbm [shape: f32[2,128,128], index: 2, kind: input, shape index: {}]   ;;  %s1930_s3 = inlined_call_operand.vmem [shape: f32[2,1,128], index: 3, kind: input, shape index: {}]   ;;  %s1931_s4 = inlined_call_operand.vmem [shape: f32[2,1,128], index: 4, kind: input, shape index: {}]   ;;  %s1932_s5 = inlined_call_operand.hbm [shape: f32[2,128,128], index: 5, kind: input, shape index: {}]   ;;  %s1933_s6 = inlined_call_operand.vmem [shape: f32[2,1,128], index: 6, kind: input, shape index: {}]   ;;  %s1934_s7 = inlined_call_operand.vmem [shape: f32[2,1,128], index: 7, kind: input, shape index: {}]   ;;  %s1935_s8 = inlined_call_operand.hbm [shape: f32[16,128], index: 8, kind: output, shape index: {0}, may-alias: {0,8}]   ;;  %s1936_s9 = inlined_call_operand.hbm [shape: f32[2,16,128], index: 9, kind: output, shape index: {1}, may-alias: {1,9}]  }
   0x1   :  { %1950 = sst [smem:[#allocation19_spill]] %s1927_s0 }
   0x2   :  { %15 = vsyncpa [#allocation3], 0 }
   0x3   :  { %16 = vsyncpa [#allocation6], 0 }
   0x4   :  { %17 = vsyncpa [#allocation4], 0 }
   0x5   :  { %18 = vsyncpa [#allocation11], 0  ;;  %s1530_s30 = smov 0   ;;  %s1532_s10 = smov 0  }
   0x6   :  { %s1534_s11 = smov 0   ;;  %s1536_s12 = smov 0  }
   0x7 LB: > { %1951 = sst [smem:[#allocation17_spill]] %s1464_s11  ;;  %s1549_s13 = sadd.s32 4294967295, %s1468_s12   ;;  %s1468_s12 = sphi %s1536_s12, %s1980_s12   ;;  %s1464_s11 = sphi %s1534_s11, %s1977_s11   ;;  %s1460_s10 = sphi %s1532_s10, %s1979_s10   ;;  %s1456_s30 = sphi %s1530_s30, %s1978_s30  }
   0x8   : > { %s1552_s14 = sadd.s32 1, %s1468_s12   ;;  %s73_s16 = sadd.s32 1, %s1464_s11 }
   0x9   : > { %s70_s15 = ssub.s32 %s1468_s12, %s1552_s14  ;;  %p80_p1 = scmp.ne.s32.totalorder %s1464_s11, %s1460_s10 }
   0xa   : > { %p71_p0 = scmp.eq.s32.totalorder %s70_s15, 0  ;;  %p81_p2 = scmp.eq.s32.totalorder %s1468_s12, 0 }
   0xb   : > { %p86_p3 = scmp.ne.s32.totalorder %s1460_s10, %s1456_s30  ;;  %p1937_p5 = scmp.eq.s32.totalorder %s1549_s13, 0 }
   0xc   : > { %s1562_s17 = scalar_select %p71_p0, %s1464_s11, %s73_s16  }
   0xd   : > { %p1564_p4 = por %p81_p2, %p80_p1  ;;  %p956_p6 = scmp.ge.s32.totalorder %s1468_s12, 1 }
   0xe   : > { %1952 = sst [smem:[#allocation18_spill]] %s1562_s17  ;;  %p269_p7 = scmp.lt.s32.totalorder %s1468_s12, 3 }
   0xf   : > { %p1573_p8 = por %p1937_p5, %p86_p3  ;;  %s1470_s21 = smov [#allocation2]  }
  0x10   : > { %p1578_p10 = pnand %p956_p6, %p269_p7  ;;  %s281_s22 = sshll.u32 %s1470_s21, 4  ;;  %s282_s22 = int_to_ptr.vmem [resolvable:$true] %s281_s22 }
  0x11   : > { %s1954_s19 = scalar_select %p1573_p8, 1, 0 }
  0x12   : > { %s1955_s20 = scalar_select %p1578_p10, 1, 0 }
  0x13   : > { %p1179_p11 = pneg %p1578_p10  ;;  %p1195_p13 = scmp.lt.s32.totalorder %s1468_s12, 2 }
  0x14   : > { %s310_s25 = sand.u32 1, %s1464_s11   ;;  %s1958_s0 = sld [smem:[#allocation19_spill]] }
  0x15   : > { %p1586_p12 = pnand %p1179_p11, %p1937_p5  ;;  %p1595_p0 = pnand %p1195_p13, %p1564_p4 }
  0x17   : > { %s1957_s26 = scalar_select %p1595_p0, 1, 0 }
  0x18   : > { %p1947_p2 = pneg %p1586_p12 }
  0x1a   : > { %s1250_s29 = scalar_lea.hbm %s1958_s0, 256 }
  0x1b   : > { %p1251_p1 = scmp.ne.s32.totalorder %s1958_s0, %s1250_s29  ;;  %p1257_p4 = scmp.lt.u32.totalorder %s1250_s29, %s1958_s0 }
  0x1d   : > { %p1253_p3 = pnand %p1947_p2, %p1251_p1 }
  0x1f   : > { %p1254_p6 = pneg %p1253_p3 }
  0x21   : > { %p1259_p7 = pnand %p1257_p4, %p1254_p6 }
  0x23   : > { %1262 = shalt.err (!%p1259_p7)
}
  0x24   : > { %s1263_s21 = scalar_lea.vmem %s282_s22, 256  ;;  %p1271_p5 = scmp.lt.s32.totalorder %s282_s22, %s282_s22 }
  0x25   : > { %p1264_p11 = scmp.ne.s32.totalorder %s282_s22, %s1263_s21  ;;  %p1272_p8 = scmp.lt.s32.totalorder %s1263_s21, %s1263_s21 }
  0x27   : > { %p1266_p13 = pnand %p1264_p11, %p1947_p2  ;;  %p1273_p10 = por %p1272_p8, %p1271_p5 }
  0x29   : > { %p1267_p9 = pneg %p1266_p13 }
  0x2b   : > { %p1274_p0 = pnand %p1273_p10, %p1267_p9 }
  0x2d   : > { %1277 = shalt.err (!%p1274_p0)
}
  0x2e   : > { %s1942_s27 = smov 128   ;;  %s1945_s28 = smov 8  }
  0x2f   : > { %1182 = dma.hbm_to_vmem [thread:$0]  (!%p1586_p12), %s1958_s0, 256, %s282_s22, [#allocation3], %s1942_s27, %s1942_s27, %s1945_s28  }
  0x30   : > { %s1624_s15 = sshll.u32 %s310_s25, 7  ;;  %s1944_s16 = sshll.u32 %s1468_s12, 11 }
  0x31   : > { %s1632_s24 = scalar_lea.hbm %s1929_s2, %s1944_s16  ;;  %s312_s17 = scalar_lea.vmem [#allocation7], %s1624_s15 }
  0x32   : > { %s319_s11 = sshll.u32 %s312_s17, 4  ;;  %s1473_s29 = smov [#allocation5]   ;;  %s1635_s11 = int_to_ptr.vmem [resolvable:$true] %s319_s11 }
  0x33   : > { %s1637_s22 = sshll.u32 %s1473_s29, 4  ;;  %s1959_s25 = sand.u32 1, %s1468_s12   ;;  %s295_s22 = int_to_ptr.vmem [resolvable:$true] %s1637_s22 }
  0x34   : > { %s1641_s30 = scalar_lea.sflag [#allocation3], %s1959_s25  ;;  %s1278_s27 = scalar_lea.hbm %s1632_s24, 2048 }
  0x35   : > { %p1279_p5 = scmp.ne.s32.totalorder %s1632_s24, %s1278_s27  ;;  %p1960_p8 = scmp.ne.s32.totalorder %s1957_s26, 0 }
  0x36   : > { %s1283_s17 = scalar_lea.hbm %s1929_s2, 4096  ;;  %p1284_p1 = scmp.lt.u32.totalorder %s1632_s24, %s1929_s2 }
  0x37   : > { %p1948_p9 = pneg %p1960_p8  ;;  %p1285_p3 = scmp.lt.u32.totalorder %s1283_s17, %s1278_s27 }
  0x38   : > { %p1287_p4 = scmp.lt.u32.totalorder %s1278_s27, %s1632_s24 }
  0x39   : > { %p1281_p10 = pnand %p1948_p9, %p1279_p5  ;;  %p1286_p6 = por %p1285_p3, %p1284_p1 }
  0x3b   : > { %p1282_p0 = pneg %p1281_p10  ;;  %p1288_p7 = por %p1287_p4, %p1286_p6 }
  0x3d   : > { %p1289_p11 = pnand %p1288_p7, %p1282_p0 }
  0x3f   : > { %1292 = shalt.err (!%p1289_p11)
}
  0x40   : > { %s1293_s29 = scalar_lea.vmem %s1635_s11, 2048  ;;  %s1474_s25 = smov [#allocation7]  }
  0x41   : > { %p1294_p13 = scmp.ne.s32.totalorder %s1635_s11, %s1293_s29  ;;  %s1298_s18 = sshll.u32 %s1474_s25, 4  ;;  %s1299_s18 = int_to_ptr.vmem [resolvable:$false] %s1298_s18 }
  0x42   : > { %s1300_s28 = scalar_lea.vmem %s1299_s18, 4096  ;;  %p1301_p2 = scmp.lt.s32.totalorder %s1635_s11, %s1299_s18 }
  0x43   : > { %p1296_p5 = pnand %p1294_p13, %p1948_p9  ;;  %p1302_p1 = scmp.lt.s32.totalorder %s1300_s28, %s1293_s29 }
  0x45   : > { %p1297_p10 = pneg %p1296_p5  ;;  %p1303_p3 = por %p1302_p1, %p1301_p2 }
  0x47   : > { %p1304_p6 = pnand %p1303_p3, %p1297_p10 }
  0x49   : > { %1307 = shalt.err (!%p1304_p6)
}
  0x4a   : > { %s1961_s27 = smov 8   ;;  %s1962_s16 = smov 128  }
  0x4b   : > { %1189 = dma.hbm_to_vmem [thread:$0]  (!%p1960_p8), %s1632_s24, 2048, %s1635_s11, %s1641_s30, %s1962_s16, %s1962_s16, %s1961_s27  }
  0x4c   : > { %s1308_s25 = scalar_lea.hbm %s1928_s1, 512  ;;  %p1963_p0 = pneg %p1586_p12 }
  0x4d   : > { %p1309_p2 = scmp.ne.s32.totalorder %s1928_s1, %s1308_s25  ;;  %p1315_p11 = scmp.lt.u32.totalorder %s1308_s25, %s1928_s1 }
  0x4f   : > { %p1311_p4 = pnand %p1309_p2, %p1963_p0 }
  0x51   : > { %p1312_p7 = pneg %p1311_p4 }
  0x53   : > { %p1317_p13 = pnand %p1315_p11, %p1312_p7 }
  0x55   : > { %1320 = shalt.err (!%p1317_p13)
}
  0x56   : > { %s1321_s11 = scalar_lea.vmem %s295_s22, 512  ;;  %p1964_p10 = pmov %p1963_p0 }
  0x57   : > { %p1322_p5 = scmp.ne.s32.totalorder %s295_s22, %s1321_s11  ;;  %p1329_p6 = scmp.lt.s32.totalorder %s295_s22, %s295_s22 }
  0x58   : > { %p1330_p9 = scmp.lt.s32.totalorder %s1321_s11, %s1321_s11 }
  0x59   : > { %p1324_p1 = pnand %p1322_p5, %p1964_p10 }
  0x5a   : > { %p1331_p8 = por %p1330_p9, %p1329_p6 }
  0x5b   : > { %p1325_p3 = pneg %p1324_p1 }
  0x5d   : > { %p1332_p0 = pnand %p1331_p8, %p1325_p3 }
  0x5f   : > { %1335 = shalt.err (!%p1332_p0)
}
  0x60   : > { %1185 = dma.hbm_to_vmem [thread:$0]  (!%p1586_p12), %s1928_s1, 512, %s295_s22, [#allocation6], %s1962_s16, %s1962_s16, %s1961_s27  }
  0x61   : > { %s1965_s21 = sshll.u32 %s1468_s12, 11  ;;  %s345_s23 = scalar_lea.vmem [#allocation8], %s1624_s15 }
  0x62   : > { %s1701_s29 = scalar_lea.hbm %s1932_s5, %s1965_s21  ;;  %s352_s18 = sshll.u32 %s345_s23, 4  ;;  %s1704_s18 = int_to_ptr.vmem [resolvable:$true] %s352_s18 }
  0x63   : > { %s1336_s28 = scalar_lea.hbm %s1701_s29, 2048  ;;  %p1966_p9 = scmp.ne.s32.totalorder %s1957_s26, 0 }
  0x64   : > { %p1337_p8 = scmp.ne.s32.totalorder %s1701_s29, %s1336_s28  ;;  %s1341_s11 = scalar_lea.hbm %s1932_s5, 4096 }
  0x65   : > { %p1967_p2 = pneg %p1966_p9  ;;  %p1342_p7 = scmp.lt.u32.totalorder %s1701_s29, %s1932_s5 }
  0x66   : > { %p1343_p11 = scmp.lt.u32.totalorder %s1341_s11, %s1336_s28  ;;  %p1345_p5 = scmp.lt.u32.totalorder %s1336_s28, %s1701_s29 }
  0x67   : > { %p1339_p4 = pnand %p1337_p8, %p1967_p2 }
  0x68   : > { %p1344_p13 = por %p1343_p11, %p1342_p7 }
  0x69   : > { %p1340_p12 = pneg %p1339_p4 }
  0x6a   : > { %p1346_p10 = por %p1345_p5, %p1344_p13 }
  0x6c   : > { %p1347_p1 = pnand %p1346_p10, %p1340_p12 }
  0x6e   : > { %1350 = shalt.err (!%p1347_p1)
}
  0x6f   : > { %s1351_s15 = scalar_lea.vmem %s1704_s18, 2048  ;;  %p1968_p6 = pmov %p1967_p2 }
  0x70   : > { %p1352_p3 = scmp.ne.s32.totalorder %s1704_s18, %s1351_s15  ;;  %s1475_s21 = smov [#allocation8]  }
  0x71   : > { %s1356_s17 = sshll.u32 %s1475_s21, 4  ;;  %s1357_s17 = int_to_ptr.vmem [resolvable:$false] %s1356_s17 }
  0x72   : > { %p1354_p0 = pnand %p1352_p3, %p1968_p6  ;;  %s1358_s25 = scalar_lea.vmem %s1357_s17, 4096 }
  0x73   : > { %p1359_p2 = scmp.lt.s32.totalorder %s1704_s18, %s1357_s17  ;;  %p1360_p4 = scmp.lt.s32.totalorder %s1358_s25, %s1351_s15 }
  0x74   : > { %p1355_p8 = pneg %p1354_p0 }
  0x75   : > { %p1361_p7 = por %p1360_p4, %p1359_p2 }
  0x77   : > { %p1362_p11 = pnand %p1361_p7, %p1355_p8 }
  0x79   : > { %1365 = shalt.err (!%p1362_p11)
}
  0x7a   : > { %1192 = dma.hbm_to_vmem [thread:$0]  (!%p1966_p9), %s1701_s29, 2048, %s1704_s18, %s1641_s30, %s1962_s16, %s1962_s16, %s1961_s27  }
  0x7b   : > { %p1969_p12 = scmp.ne.s32.totalorder %s1955_s20, 0 }
  0x7c   : > { %p1970_p13 = scmp.eq.s32.totalorder (!%p1969_p12), %s1549_s13, 0 }
  0x7d   : > { %376 = sbr.rel (%p1969_p12) target bundleno = 500 (0x1f4), region = 52 }
  0x84   : > { %1435 = dma.done.wait (%p1970_p13), [#allocation3], 256   ;;  %p1971_p5 = pmov %p1970_p13 }
  0x86   : > { %1437 = vsyncadd (%p1971_p5), [#allocation3], 4294967040  ;;  %p1972_p10 = pmov %p1971_p5 }
  0x87   : > { %p1973_p1 = pmov %p1971_p5 }
  0x88   : > { %1439 = dma.done.wait (%p1972_p10), [#allocation6], 512  }
  0x89   : > { %1441 = vsyncadd (%p1973_p1), [#allocation6], 4294966784  ;;  %s386_s26 = sand.u32 1, %s1549_s13   ;;  %s388_s30 = sand.u32 1, %s1460_s10  }
  0x8a   : > { %s969_s27 = sshll.u32 %s388_s30, 7  ;;  %s387_s20 = scalar_lea.sflag [#allocation3], %s386_s26 }
  0x8b   : > { %s1745_s16 = scalar_lea.vmem [#allocation7], %s969_s27  ;;  %p1974_p9 = scmp.ne.s32.totalorder %s1954_s19, 0 }
  0x8d   : > { %1443 = dma.done.wait (%p1974_p9), %s387_s20, 4096  }
  0x8e   : > { %1445 = vsyncadd (%p1974_p9), %s387_s20, 4294963200  ;;  %p446_p3 = scmp.lt.s32.totalorder %s1549_s13, 1  ;;  %s1771_s25 = scalar_lea.vmem [#allocation8], %s969_s27 }
  0x8f   : > { %p1975_p6 = scmp.ne.s32.totalorder %s1549_s13, 0 }
  0x90   : > { %s1753_s29 = scalar_select %p446_p3, %s1549_s13, 1 }
  0x91   : > { %461 = sbr.rel (%p1975_p6) target bundleno = 152 (0x98), region = 72  ;;  %v462_v0 = vld [vmem:[#allocation2] sm:$0xff] (!%p1975_p6)  ;;  %v463_v1 = vld [vmem:[#allocation2 + $0x8] sm:$0xff] (!%p1975_p6)  ;;  %v466_v2 = vld [vmem:[#allocation5] sm:$0xff] (!%p1975_p6) }
  0x92   : > { %s448_s28 = scalar_lea.vmem %s1930_s3, %s1753_s29  ;;  %s451_s11 = scalar_lea.vmem %s1931_s4, %s1753_s29  ;;  %464 = vst [vmem:[#allocation9] sm:$0xff] (!%p1975_p6), %v462_v0  ;;  %465 = vst [vmem:[#allocation9 + $0x8] sm:$0xff] (!%p1975_p6), %v463_v1  ;;  %v467_v3 = vld [vmem:[#allocation5 + $0x8] sm:$0xff] (!%p1975_p6)  ;;  %v468_v4 = vld [vmem:[#allocation5 + $0x10] sm:$0xff] (!%p1975_p6) }
  0x93   : > { %s454_s24 = scalar_lea.vmem %s1933_s6, %s1753_s29  ;;  %s457_s17 = scalar_lea.vmem %s1934_s7, %s1753_s29  ;;  %470 = vst [vmem:[#allocation10] sm:$0xff] (!%p1975_p6), %v466_v2  ;;  %v469_v5 = vld [vmem:[#allocation5 + $0x18] sm:$0xff] (!%p1975_p6)  ;;  %471 = vst [vmem:[#allocation10 + $0x8] sm:$0xff] (!%p1975_p6), %v467_v3 }
  0x94   : > { %472 = vst [vmem:[#allocation10 + $0x10] sm:$0xff] (!%p1975_p6), %v468_v4  ;;  %473 = vst [vmem:[#allocation10 + $0x18] sm:$0xff] (!%p1975_p6), %v469_v5 }
  0x98 PF: > { %v476_v6 = vld [vmem:[%s1745_s16] sm:$0xff]  ;;  %v477_v7 = vld [vmem:[%s1745_s16 + $0x8] sm:$0xff]  ;;  %v478_v11 = vld [vmem:[%s1745_s16 + $0x10] sm:$0xff]  ;;  %p1198_p0 = scmp.eq.s32.totalorder %s1549_s13, 1 }
  0x99   : > { %v624_v8 = vld [vmem:[%s1771_s25] sm:$0xff]  ;;  %v1095_v9 = vpack.c.bf16 %v477_v7, %v476_v6  ;;  %v625_v10 = vld [vmem:[%s1771_s25 + $0x8] sm:$0xff]  ;;  %v479_v12 = vld [vmem:[%s1745_s16 + $0x18] sm:$0xff] }
  0x9a   : > { %v1127_v13 = vpack.c.bf16 %v625_v10, %v624_v8  ;;  %v1099_v14 = vpack.c.bf16 %v479_v12, %v478_v11  ;;  %v626_v15 = vld [vmem:[%s1771_s25 + $0x10] sm:$0xff]  ;;  %v627_v16 = vld [vmem:[%s1771_s25 + $0x18] sm:$0xff]  ;;  %v480_v17 = vld [vmem:[%s1745_s16 + $0x20] sm:$0xff] }
  0x9b   : > { %1096 = vmatprep.subr.bf16.mxu0 %v1095_v9  ;;  %v1131_v18 = vpack.c.bf16 %v627_v16, %v626_v15  ;;  %v481_v19 = vld [vmem:[%s1745_s16 + $0x28] sm:$0xff]  ;;  %v628_v20 = vld [vmem:[%s1771_s25 + $0x20] sm:$0xff]  ;;  %v482_v24 = vld [vmem:[%s1745_s16 + $0x30] sm:$0xff] }
  0x9c   : > { %v629_v21 = vld [vmem:[%s1771_s25 + $0x28] sm:$0xff]  ;;  %1128 = vmatprep.subr.bf16.mxu1 %v1127_v13  ;;  %1098 = vmatpush3.bf16.msra.mxu0 %v1095_v9  ;;  %v1103_v22 = vpack.c.bf16 %v481_v19, %v480_v17  ;;  %v483_v25 = vld [vmem:[%s1745_s16 + $0x38] sm:$0xff]  ;;  %v630_v26 = vld [vmem:[%s1771_s25 + $0x30] sm:$0xff] }
  0x9d   : > { %1130 = vmatpush3.bf16.msra.mxu1 %v1127_v13  ;;  %1100 = vmatprep.subr.bf16.mxu0 %v1099_v14  ;;  %v1135_v23 = vpack.c.bf16 %v629_v21, %v628_v20  ;;  %v631_v27 = vld [vmem:[%s1771_s25 + $0x38] sm:$0xff]  ;;  %v1107_v28 = vpack.c.bf16 %v483_v25, %v482_v24  ;;  %v484_v30 = vld [vmem:[%s1745_s16 + $0x40] sm:$0xff]  ;;  %v485_v31 = vld [vmem:[%s1745_s16 + $0x48] sm:$0xff] }
  0x9e   : > { %1132 = vmatprep.subr.bf16.mxu1 %v1131_v18  ;;  %v1139_v29 = vpack.c.bf16 %v631_v27, %v630_v26  ;;  %v474_v32 = vld [vmem:[#allocation9] sm:$0xff]  ;;  %v633_v34 = vld [vmem:[%s1771_s25 + $0x48] sm:$0xff]  ;;  %v620_v35 = vld [vmem:[#allocation10] sm:$0xff]  ;;  %v1111_v36 = vpack.c.bf16 %v485_v31, %v484_v30 }
  0x9f   : > { %v632_v33 = vld [vmem:[%s1771_s25 + $0x40] sm:$0xff]  ;;  %1054 = vmatprep.mubr.f32.mxu0 %v474_v32  ;;  %1089 = vmatprep.mubr.f32.mxu1 %v620_v35  ;;  %v486_v38 = vld [vmem:[%s1745_s16 + $0x50] sm:$0xff]  ;;  %v487_v39 = vld [vmem:[%s1745_s16 + $0x58] sm:$0xff] }
  0xa0   : > { %1102 = vmatpush3.bf16.msra.mxu0 %v1099_v14  ;;  %v1143_v37 = vpack.c.bf16 %v633_v34, %v632_v33  ;;  %v634_v40 = vld [vmem:[%s1771_s25 + $0x50] sm:$0xff]  ;;  %v635_v41 = vld [vmem:[%s1771_s25 + $0x58] sm:$0xff]  ;;  %v1115_v42 = vpack.c.bf16 %v487_v39, %v486_v38  ;;  %v488_v44 = vld [vmem:[%s1745_s16 + $0x60] sm:$0xff] }
  0xa1   : > { %1134 = vmatpush3.bf16.msra.mxu1 %v1131_v18  ;;  %1104 = vmatprep.subr.bf16.mxu0 %v1103_v22  ;;  %v1147_v43 = vpack.c.bf16 %v635_v41, %v634_v40  ;;  %v489_v45 = vld [vmem:[%s1745_s16 + $0x68] sm:$0xff]  ;;  %v636_v46 = vld [vmem:[%s1771_s25 + $0x60] sm:$0xff]  ;;  %v490_v50 = vld [vmem:[%s1745_s16 + $0x70] sm:$0xff] }
  0xa2   : > { %1136 = vmatprep.subr.bf16.mxu1 %v1135_v23  ;;  %v637_v47 = vld [vmem:[%s1771_s25 + $0x68] sm:$0xff]  ;;  %v1119_v48 = vpack.c.bf16 %v489_v45, %v488_v44  ;;  %v491_v51 = vld [vmem:[%s1745_s16 + $0x78] sm:$0xff]  ;;  %v638_v52 = vld [vmem:[%s1771_s25 + $0x70] sm:$0xff]  ;;  %s1476_s16 = smov [#allocation9]  }
  0xa3   : > { %v1151_v49 = vpack.c.bf16 %v637_v47, %v636_v46  ;;  %v639_v53 = vld [vmem:[%s1771_s25 + $0x78] sm:$0xff]  ;;  %v1123_v54 = vpack.c.bf16 %v491_v51, %v490_v50  ;;  %v475_v56 = vld [vmem:[#allocation9 + $0x8] sm:$0xff]  ;;  %v622_v58 = vld [vmem:[#allocation10 + $0x10] sm:$0xff]  ;;  %s803_s23 = sshll.u32 %s1476_s16, 4  ;;  %s804_s23 = int_to_ptr.vmem [resolvable:$true] %s803_s23 }
  0xa4   : > { %1106 = vmatpush3.bf16.msra.mxu0 %v1103_v22  ;;  %v1155_v55 = vpack.c.bf16 %v639_v53, %v638_v52  ;;  %v621_v57 = vld [vmem:[#allocation10 + $0x8] sm:$0xff]  ;;  %v623_v59 = vld [vmem:[#allocation10 + $0x18] sm:$0xff]  ;;  %v972_v50 = vld [vmem:[%s448_s28] ss:$0 sm:$0xff]  ;;  %s1366_s18 = scalar_lea.vmem %s804_s23, 256  ;;  %p1373_p7 = scmp.lt.s32.totalorder %s804_s23, %s804_s23 }
  0xa5   : > { %1138 = vmatpush3.bf16.msra.mxu1 %v1135_v23  ;;  %1108 = vmatprep.subr.bf16.mxu0 %v1107_v28  ;;  %p1367_p8 = scmp.ne.s32.totalorder %s804_s23, %s1366_s18  ;;  %p1374_p11 = scmp.lt.s32.totalorder %s1366_s18, %s1366_s18 }
  0xa6   : > { %1140 = vmatprep.subr.bf16.mxu1 %v1139_v29 }
  0xa7   : > { %p1368_p2 = pnand %p1367_p8, %p1198_p0  ;;  %p1375_p12 = por %p1374_p11, %p1373_p7 }
  0xa8   : > { %1110 = vmatpush3.bf16.msra.mxu0 %v1107_v28 }
  0xa9   : > { %1142 = vmatpush3.bf16.msra.mxu1 %v1139_v29  ;;  %1112 = vmatprep.subr.bf16.mxu0 %v1111_v36  ;;  %p1369_p4 = pneg %p1368_p2 }
  0xaa   : > { %1144 = vmatprep.subr.bf16.mxu1 %v1143_v37 }
  0xab   : > { %p1376_p13 = pnand %p1375_p12, %p1369_p4 }
  0xac   : > { %1114 = vmatpush3.bf16.msra.mxu0 %v1111_v36 }
  0xad   : > { %1146 = vmatpush3.bf16.msra.mxu1 %v1143_v37  ;;  %1116 = vmatprep.subr.bf16.mxu0 %v1115_v42 }
  0xae   : > { %1148 = vmatprep.subr.bf16.mxu1 %v1147_v43 }
  0xb0   : > { %1118 = vmatpush3.bf16.msra.mxu0 %v1115_v42 }
  0xb1   : > { %1150 = vmatpush3.bf16.msra.mxu1 %v1147_v43  ;;  %1120 = vmatprep.subr.bf16.mxu0 %v1119_v48 }
  0xb2   : > { %1152 = vmatprep.subr.bf16.mxu1 %v1151_v49 }
  0xb4   : > { %1122 = vmatpush3.bf16.msra.mxu0 %v1119_v48 }
  0xb5   : > { %1154 = vmatpush3.bf16.msra.mxu1 %v1151_v49  ;;  %1124 = vmatprep.subr.bf16.mxu0 %v1123_v54 }
  0xb6   : > { %1156 = vmatprep.subr.bf16.mxu1 %v1155_v55 }
  0xb8   : > { %1126 = vmatpush3.bf16.msra.mxu0 %v1123_v54  ;;  %v973_v54 = vld [vmem:[%s451_s11] ss:$0 sm:$0xff] }
  0xb9   : > { %1158 = vmatpush3.bf16.msra.mxu1 %v1155_v55 }
  0xbb   : > { %1055 = vmatmul.mubr.f32.vlgmr.msra.gmra.mrb[0].mxu0 %v475_v56 }
  0xbc   : > { %1090 = vmatmul.mubr.f32.vlgmr.msra.gmra.mrb[0].mxu1 %v621_v57 }
  0xbd   : > { %1092 = vmatprep.mubr.f32.mxu1 %v622_v58 }
  0xc0   : > { %1093 = vmatmul.mubr.f32.gmra.mrb[2].mxu1 %v623_v59 }
 0x18e   : > { %v1056_v60 = vpop.f32.mrb[0].mxu0 }
 0x18f   : > { %v575_v61 = vmul.f32 %v1056_v60, %v1056_v60  ;;  %v1807_v62 = vpop.f32.mrb[0].mxu1  ;;  %v558_v63 = vpop.f32.mrb[1].mxu0 }
 0x190   : > { %v567_v0 = vadd.f32 %v1056_v60, %v558_v63  ;;  %v574_v1 = vmul.f32 %v558_v63, %v558_v63  ;;  %v1809_v2 = vpop.f32.mrb[1].mxu1  ;;  %v726_v6 = vmul.f32 %v1807_v62, %v1807_v62 }
 0x191   : > { %v725_v11 = vmul.f32 %v1809_v2, %v1809_v2 }
 0x192   : > { %v568_v3 = vrot.slane %v567_v0, 4  ;;  %v576_v4 = vadd.f32 %v575_v61, %v574_v1 }
 0x193   : > { %v1811_v5 = vpop.f32.mrb[2].mxu1 }
 0x194   : > { %v569_v7 = vadd.f32 %v568_v3, %v567_v0  ;;  %v577_v8 = vrot.slane %v576_v4, 4  ;;  %v728_v9 = vmul.f32 %v1811_v5, %v1811_v5  ;;  %v1817_v10 = vpop.f32.mrb[3].mxu1 }
 0x195   : > { %v727_v12 = vmul.f32 %v1817_v10, %v1817_v10 }
 0x196   : > { %v570_v13 = vrot.slane %v569_v7, 2  ;;  %v578_v14 = vadd.f32 %v577_v8, %v576_v4  ;;  %v730_v15 = vadd.f32 %v728_v9, %v726_v6 }
 0x197   : > { %v729_v16 = vadd.f32 %v727_v12, %v725_v11 }
 0x198   : > { %v571_v17 = vadd.f32 %v570_v13, %v569_v7  ;;  %v579_v18 = vrot.slane %v578_v14, 2  ;;  %v732_v19 = vmax.f32 %v730_v15, 1e-16 }
 0x199   : > { %v731_v20 = vmax.f32 %v729_v16, 1e-16  ;;  %v744_v21 = vadd.f32 %v730_v15, %v729_v16 }
 0x19a   : > { %v572_v22 = vrot.slane %v571_v17, 1  ;;  %v580_v23 = vadd.f32 %v579_v18, %v578_v14  ;;  %1242 = vrsqrt.f32 %v732_v19 }
 0x19b   : > { %1244 = vrsqrt.f32 %v731_v20  ;;  %v745_v28 = vrot.slane %v744_v21, 4 }
 0x19c   : > { %v573_v24 = vadd.f32 %v572_v22, %v571_v17  ;;  %v581_v25 = vrot.slane %v580_v23, 1 }
 0x19d   : > { %v746_v36 = vadd.f32 %v745_v28, %v744_v21 }
 0x19e   : > { %v582_v26 = vadd.f32 %v581_v25, %v580_v23  ;;  %v583_v27 = vmul.f32 0.0625, %v573_v24 }
 0x19f   : > { %v747_v42 = vrot.slane %v746_v36, 2 }
 0x1a0   : > { %v584_v29 = vmul.f32 0.0625, %v582_v26  ;;  %v585_v30 = vmul.f32 %v583_v27, %v583_v27  ;;  %v588_v31 = vsub.f32 %v558_v63, %v583_v27  ;;  %v589_v32 = vsub.f32 %v1056_v60, %v583_v27 }
 0x1a1   : > { %v748_v45 = vadd.f32 %v747_v42, %v746_v36 }
 0x1a2   : > { %v586_v33 = vsub.f32 %v584_v29, %v585_v30 }
 0x1a3   : > { %v749_v48 = vrot.slane %v748_v45, 1 }
 0x1a4   : > { %v1823_v34 = vpop.eup %1242  ;;  %v587_v35 = vmax.f32 %v586_v33, 0.0 }
 0x1a5   : > { %v1825_v37 = vpop.eup %1244  ;;  %v1828_v38 = vmul.f32 %v1823_v34, %v730_v15  ;;  %v750_v56 = vadd.f32 %v749_v48, %v748_v45 }
 0x1a6   : > { %v590_v39 = vadd.f32 1e-05, %v587_v35  ;;  %v1831_v40 = vmul.f32 %v1825_v37, %v729_v16 }
 0x1a7   : > { %v752_v63 = vmul.f32 0.0625, %v750_v56 }
 0x1a8   : > { %1246 = vrsqrt.f32 %v590_v39  ;;  %v737_v41 = vadd.f32 %v1828_v38, %v1831_v40 }
 0x1aa   : > { %v738_v43 = vrot.slane %v737_v41, 4 }
 0x1ac   : > { %v739_v44 = vadd.f32 %v738_v43, %v737_v41 }
 0x1ae   : > { %v740_v46 = vrot.slane %v739_v44, 2 }
 0x1b0   : > { %v741_v47 = vadd.f32 %v740_v46, %v739_v44 }
 0x1b2   : > { %v1247_v49 = vpop.eup %1246  ;;  %v742_v51 = vrot.slane %v741_v47, 1 }
 0x1b3   : > { %v592_v52 = vmul.f32 %v1247_v49, %v588_v31  ;;  %v593_v53 = vmul.f32 %v1247_v49, %v589_v32 }
 0x1b4   : > { %v743_v55 = vadd.f32 %v742_v51, %v741_v47 }
 0x1b5   : > { %v601_v57 = vmul.f32 %v972_v50, %v592_v52  ;;  %v602_v58 = vmul.f32 %v972_v50, %v593_v53 }
 0x1b6   : > { %v751_v59 = vmul.f32 0.0625, %v743_v55 }
 0x1b7   : > { %v610_v60 = vadd.f32 %v973_v54, %v601_v57  ;;  %v611_v61 = vadd.f32 %v973_v54, %v602_v58 }
 0x1b8   : > { %v753_v0 = vmul.f32 %v751_v59, %v751_v59  ;;  %v756_v1 = vsub.f32 %v1831_v40, %v751_v59  ;;  %v757_v3 = vsub.f32 %v1828_v38, %v751_v59 }
 0x1b9   : > { %v614_v4 = vmul.f32 0.2, %v610_v60  ;;  %vm612_vm0 = vcmp.ge.f32.partialorder %v610_v60, 0.0  ;;  %vm613_vm1 = vcmp.ge.f32.partialorder %v611_v61, 0.0  ;;  %v615_v6 = vmul.f32 0.2, %v611_v61 }
 0x1ba   : > { %v754_v7 = vsub.f32 %v752_v63, %v753_v0 }
 0x1bb   : > { %v616_v8 = vsel %vm612_vm0, %v610_v60, %v614_v4  ;;  %v617_v9 = vsel %vm613_vm1, %v611_v61, %v615_v6 }
 0x1bc   : > { %v755_v11 = vmax.f32 %v754_v7, 0.0  ;;  %618 = vst [vmem:[#allocation9] sm:$0xff] %v616_v8  ;;  %619 = vst [vmem:[#allocation9 + $0x8] sm:$0xff] %v617_v9 }
 0x1bd   : > { %1379 = shalt.err (!%p1376_p13)
}
 0x1be   : > { %s1380_s22 = scalar_lea.hbm %s1935_s8, 256 }
 0x1bf   : > { %p1381_p5 = scmp.ne.s32.totalorder %s1935_s8, %s1380_s22  ;;  %p1386_p9 = scmp.lt.u32.totalorder %s1380_s22, %s1935_s8 }
 0x1c1   : > { %p1382_p10 = pnand %p1381_p5, %p1198_p0 }
 0x1c3   : > { %p1383_p1 = pneg %p1382_p10 }
 0x1c5   : > { %p1388_p3 = pnand %p1386_p9, %p1383_p1 }
 0x1c7   : > { %1391 = shalt.err (!%p1388_p3)
}
 0x1c8   : > { %s1477_s21 = smov 128   ;;  %s1478_s25 = smov 8   ;;  %v758_v12 = vadd.f32 1e-05, %v755_v11  ;;  %v974_v14 = vld [vmem:[%s454_s24] ss:$0 sm:$0xff] }
 0x1c9   : > { %1172 = dma.vmem_to_hbm [thread:$0]  (%p1198_p0), %s804_s23, 256, %s1935_s8, [#allocation4], %s1477_s21, %s1477_s21, %s1478_s25  }
 0x1ca   : > { %1248 = vrsqrt.f32 %v758_v12  ;;  %v975_v17 = vld [vmem:[%s457_s17] ss:$0 sm:$0xff]  ;;  %s1479_s23 = smov [#allocation10]  }
 0x1cb   : > { %s816_s24 = sshll.u32 %s1479_s23, 4  ;;  %s817_s24 = int_to_ptr.vmem [resolvable:$true] %s816_s24 }
 0x1cc   : > { %s1392_s29 = scalar_lea.vmem %s817_s24, 512  ;;  %p1399_p4 = scmp.lt.s32.totalorder %s817_s24, %s817_s24 }
 0x1cd   : > { %p1393_p6 = scmp.ne.s32.totalorder %s817_s24, %s1392_s29  ;;  %p1400_p7 = scmp.lt.s32.totalorder %s1392_s29, %s1392_s29 }
 0x1cf   : > { %p1394_p8 = pnand %p1393_p6, %p1198_p0  ;;  %p1401_p11 = por %p1400_p7, %p1399_p4 }
 0x1d1   : > { %p1395_p2 = pneg %p1394_p8 }
 0x1d3   : > { %p1402_p12 = pnand %p1401_p11, %p1395_p2 }
 0x1d4   : > { %v1249_v13 = vpop.eup %1248 }
 0x1d5   : > { %v760_v15 = vmul.f32 %v1249_v13, %v756_v1  ;;  %v761_v16 = vmul.f32 %v1249_v13, %v757_v3 }
 0x1d7   : > { %v769_v18 = vmul.f32 %v974_v14, %v760_v15  ;;  %v770_v19 = vmul.f32 %v974_v14, %v761_v16 }
 0x1d9   : > { %v778_v20 = vadd.f32 %v975_v17, %v769_v18  ;;  %v779_v21 = vadd.f32 %v975_v17, %v770_v19 }
 0x1db   : > { %vm780_vm2 = vcmp.ge.f32.partialorder %v778_v20, 0.0  ;;  %vm781_vm3 = vcmp.ge.f32.partialorder %v779_v21, 0.0  ;;  %v782_v22 = vmul.f32 0.2, %v778_v20  ;;  %v783_v23 = vmul.f32 0.2, %v779_v21 }
 0x1dd   : > { %v784_v24 = vsel %vm780_vm2, %v778_v20, %v782_v22  ;;  %v785_v25 = vsel %vm781_vm3, %v779_v21, %v783_v23 }
 0x1de   : > { %v786_v26 = vmul.f32 %v1825_v37, %v784_v24  ;;  %v787_v27 = vmul.f32 %v1823_v34, %v785_v25 }
 0x1e0   : > { %v788_v28 = vmul.f32 %v786_v26, %v1809_v2  ;;  %v790_v29 = vmul.f32 %v786_v26, %v1817_v10  ;;  %v789_v30 = vmul.f32 %v1807_v62, %v787_v27  ;;  %v791_v31 = vmul.f32 %v1811_v5, %v787_v27 }
 0x1e2   : > { %792 = vst [vmem:[#allocation10] sm:$0xff] %v788_v28  ;;  %795 = vst [vmem:[#allocation10 + $0x10] sm:$0xff] %v790_v29 }
 0x1e3   : > { %793 = vst [vmem:[#allocation10 + $0x8] sm:$0xff] %v789_v30  ;;  %796 = vst [vmem:[#allocation10 + $0x18] sm:$0xff] %v791_v31 }
 0x1e4   : > { %1405 = shalt.err (!%p1402_p12)
}
 0x1e5   : > { %s1406_s12 = scalar_lea.hbm %s1936_s9, 512 }
 0x1e6   : > { %p1407_p13 = scmp.ne.s32.totalorder %s1936_s9, %s1406_s12  ;;  %p1412_p1 = scmp.lt.u32.totalorder %s1406_s12, %s1936_s9 }
 0x1e8   : > { %p1408_p5 = pnand %p1407_p13, %p1198_p0 }
 0x1ea   : > { %p1409_p10 = pneg %p1408_p5 }
 0x1ec   : > { %p1414_p9 = pnand %p1412_p1, %p1409_p10 }
 0x1ee   : > { %1417 = shalt.err (!%p1414_p9)
}
 0x1ef   : > { %1174 = dma.vmem_to_hbm [thread:$0]  (%p1198_p0), %s817_s24, 512, %s1936_s9, [#allocation11], %s1477_s21, %s1477_s21, %s1478_s25  }
 0x1f0   : > { %1447 = dma.done.wait (%p1198_p0), [#allocation4], 256  }
 0x1f1   : > { %1449 = vsyncadd (%p1198_p0), [#allocation4], 4294967040 }
 0x1f2   : > { %1451 = dma.done.wait (%p1198_p0), [#allocation11], 512  }
 0x1f3   : > { %1453 = vsyncadd (%p1198_p0), [#allocation11], 4294966784 }
 0x1f4 PF: > { %s1976_s27 = sld [smem:[#allocation17_spill]]  ;;  %s1977_s11 = sld [smem:[#allocation18_spill]] }
 0x1f5   : > { %p21_p3 = scmp.ge.s32.totalorder %s1552_s14, 4   ;;  %s1978_s30 = smov %s1460_s10 }
 0x1f6   : > { %s1980_s12 = smov %s1552_s14 }
 0x1f7   :  { %23 = sbr.rel (!%p21_p3) target bundleno = 7 (0x7), region = 132 }
 0x1fa   : > { %s1979_s10 = smov %s1976_s27 }
 0x1fe   :  { %836 = vsyncpa [#allocation3], 1 }
 0x1ff   :  { %838 = vsyncpa [#allocation3 + $0x1], 1 }
 0x200   :  { %839 = vsyncpa [#allocation6], 1 }
 0x201   :  { %840 = vsyncpa [#allocation4], 1 }
 0x202   :  { %842 = vsyncpa [#allocation4 + $0x1], 1 }
 0x203   :  { %843 = vsyncpa [#allocation11], 1 }

</bundles_post_ra>
